<compile_context>
chip_gen: v7x
topology: tpu7x:2x2x1
jax: 0.10.0
libtpu: 0.0.40
codegen_flags: <defaults>
</compile_context>

<pallas_src>
import math

import jax
import jax.numpy as jnp
from jax.experimental import pallas as pl
from jax.experimental.pallas import tpu as pltpu


# --------------------------------------------------------------------------
# Static pooling geometry (all Python ints -> static slices in the kernel).
# --------------------------------------------------------------------------
def _pool_geometry(H, W, num_levels):
    levels = []
    row_bounds = {0, H}
    for i in range(1, num_levels + 1):
        h = int(math.ceil(H / i))
        w = int(math.ceil(W / i))
        h_left = (h * i - H) // 2
        w_left = (w * i - W) // 2
        groups_r, groups_c = [], []
        for a in range(i):
            r0 = max(0, a * h - h_left)
            r1 = min(H, (a + 1) * h - h_left)
            groups_r.append((r0, r1))
            if r1 > r0:
                row_bounds.update((r0, r1))
        for b in range(i):
            c0 = max(0, b * w - w_left)
            c1 = min(W, (b + 1) * w - w_left)
            groups_c.append((c0, c1))
        levels.append((i, h, w, groups_r, groups_c))
    bounds = sorted(row_bounds)
    segments = [(bounds[k], bounds[k + 1]) for k in range(len(bounds) - 1)]
    return segments, levels


# --------------------------------------------------------------------------
# Kernel: one (batch-fold, channel-tile) block of the NCHW input.
#   x_ref:   (nb, c_tile, H, W)      W on lanes, H on sublanes
#   out_ref: (nb, c_tile, total)     one lane column per pooling window
# --------------------------------------------------------------------------
def make_spp_kernel(nb, c_tile, segments, levels):
    def kernel(x_ref, out_ref):
        for n in range(nb):
            # ---- Phase A: ONE fused sweep over H -> per-segment row maxima.
            seg_max = []
            for (s0, s1) in segments:
                slab = x_ref[n, :, s0:s1, :]              # (c_tile, s1-s0, W)
                seg_max.append(jnp.max(slab, axis=1))     # (c_tile, W)

            # ---- Phase B: assemble each level's row groups from segment
            # partials, then per-window column maxima (lane reduce).
            cols = []
            zero_col = jnp.zeros((c_tile, 1), dtype=out_ref.dtype)
            for (i, h, w, groups_r, groups_c) in levels:
                for a in range(i):
                    r0, r1 = groups_r[a]
                    rg = None
                    if r1 > r0:
                        for k, (s0, s1) in enumerate(segments):
                            if s0 >= r0 and s1 <= r1:
                                rg = seg_max[k] if rg is None else jnp.maximum(rg, seg_max[k])
                    for b in range(i):
                        c0, c1 = groups_c[b]
                        if rg is None or c1 <= c0:
                            cols.append(zero_col)         # window is all zero padding
                        else:
                            wm = jnp.max(rg[:, c0:c1], axis=1, keepdims=True)  # (c_tile, 1)
                            if (r1 - r0) != h or (c1 - c0) != w:
                                # Window overlaps the ZeroPad2d border -> zeros join the max.
                                wm = jnp.maximum(wm, jnp.zeros((), wm.dtype))
                            cols.append(wm.astype(out_ref.dtype))
            # Single store per batch element (instead of `total` 1-row stores).
            out_ref[n, :, :] = jnp.concatenate(cols, axis=1)   # (c_tile, total)

    return kernel


# --------------------------------------------------------------------------
# VMEM-aware tiling helpers.
# --------------------------------------------------------------------------
def _ceil_to(x, m):
    return -(-x // m) * m


def _padded2d_bytes(rows, cols, itemsize):
    """VMEM footprint of a 2-D (rows, cols) slab after (sublane, 128) padding."""
    sub = 8 * max(1, 4 // itemsize)          # 8 for f32, 16 for bf16, 32 for i8
    return _ceil_to(max(rows, 1), sub) * _ceil_to(max(cols, 1), 128) * itemsize


def _vmem_capacity_bytes():
    try:
        return int(pltpu.get_tpu_info().vmem_capacity_bytes)
    except Exception:
        return 64 * 1024 * 1024              # conservative floor (v7x)


def _choose_c_tile(C, H, W, total, n_seg, itemsize, budget):
    """Largest channel tile whose double-buffered blocks (+ temps) fit the budget."""
    per_ch_in = _padded2d_bytes(H, W, itemsize)

    def need(ct):
        in_b = ct * per_ch_in
        out_b = _padded2d_bytes(ct, total, itemsize)
        seg_b = n_seg * _padded2d_bytes(ct, W, itemsize)
        return 2 * (in_b + out_b) + seg_b

    def pick(c_full):
        cands = sorted({d for d in range(8, c_full + 1, 8) if c_full % d == 0} | {c_full},
                       reverse=True)
        for ct in cands:
            if need(ct) <= budget:
                return ct
        return None

    ct = pick(C)
    if ct is not None:
        return ct, C
    # C has no usable tile that fits (e.g. huge C with no multiple-of-8 divisor):
    # pad the channel dim to regain tiling freedom.  Padding traffic is tiny
    # relative to reading the feature map.
    c_pad = _ceil_to(C, 8)
    ct = pick(c_pad)
    if ct is None:
        ct = 8                               # smallest tile; vmem_limit is raised below.
    return ct, c_pad


def _choose_nb(N, num_c_tiles, in_block_1, out_block_1, seg_bytes, budget):
    """Fold small batches into one block (block-size floor), but keep a
    parallel grid extent >= 2 whenever possible (v7x has 2 TensorCores)."""
    floor_bytes = 1 << 20
    nb = 1
    for cand in range(2, min(N, 8) + 1):
        if N % cand:
            continue
        if nb * in_block_1 >= floor_bytes:
            break
        if 2 * cand * (in_block_1 + out_block_1) + cand * seg_bytes > budget:
            break
        if N * num_c_tiles >= 2 and (N // cand) * num_c_tiles < 2:
            break
        nb = cand
    return nb


# --------------------------------------------------------------------------
# Wrapper: (N, C, H, W) -> (N, C * sum_{i=1..L} i^2), matching PyTorch SPPLayer.
# --------------------------------------------------------------------------
def spp_layer_pallas(x, num_levels):
    N, C, H, W = x.shape
    total = sum(i * i for i in range(1, num_levels + 1))
    itemsize = jnp.dtype(x.dtype).itemsize

    segments, levels = _pool_geometry(H, W, num_levels)
    n_seg = len(segments)

    vmem_cap = _vmem_capacity_bytes()
    budget = int(vmem_cap * 0.45)

    c_tile, c_pad = _choose_c_tile(C, H, W, total, n_seg, itemsize, budget)
    num_c_tiles = c_pad // c_tile

    in_block_1 = c_tile * _padded2d_bytes(H, W, itemsize)
    out_block_1 = _padded2d_bytes(c_tile, total, itemsize)
    seg_bytes = n_seg * _padded2d_bytes(c_tile, W, itemsize)

    nb = _choose_nb(N, num_c_tiles, in_block_1, out_block_1, seg_bytes, budget)

    need = 2 * nb * (in_block_1 + out_block_1) + nb * seg_bytes + (4 << 20)
    vmem_limit = int(min(max(need, 32 << 20), vmem_cap * 92 // 100))

    if c_pad != C:
        x = jnp.pad(x, ((0, 0), (0, c_pad - C), (0, 0), (0, 0)))

    cost = pl.CostEstimate(
        flops=N * c_pad * H * W * 2 + N * c_pad * total * W,   # max-compares, no MXU
        transcendentals=0,
        bytes_accessed=N * c_pad * H * W * itemsize + N * c_pad * total * itemsize,
    )

    out = pl.pallas_call(
        make_spp_kernel(nb, c_tile, segments, levels),
        out_shape=jax.ShapeDtypeStruct((N, c_pad, total), x.dtype),
        grid=(N // nb, num_c_tiles),
        in_specs=[pl.BlockSpec((nb, c_tile, H, W), lambda n, c: (n, c, 0, 0))],
        out_specs=pl.BlockSpec((nb, c_tile, total), lambda n, c: (n, c, 0)),
        compiler_params=pltpu.CompilerParams(
            dimension_semantics=("parallel", "parallel"),
            vmem_limit_bytes=vmem_limit,
        ),
        cost_estimate=cost,
    )(x)

    if c_pad != C:
        out = out[:, :C, :]

    # Per-level C-major flatten (torch's z.view(N, -1)), then concat levels.
    pieces = []
    off = 0
    for i in range(1, num_levels + 1):
        pieces.append(out[:, :, off:off + i * i].reshape(N, -1))
        off += i * i
    return jnp.concatenate(pieces, axis=1)


# --------------------------------------------------------------------------
# Pure-JAX reference mirroring the PyTorch forward exactly.
# --------------------------------------------------------------------------
def spp_layer_ref(x, num_levels):
    N, C, H, W = x.shape
    pieces = []
    for i in range(1, num_levels + 1):
        h = int(math.ceil(H / i))
        w = int(math.ceil(W / i))
        diff_h = h * i - H
        diff_w = w * i - W
        hl = diff_h // 2
        hr = diff_h - hl
        wl = diff_w // 2
        wr = diff_w - wl
        y = jnp.pad(x, ((0, 0), (0, 0), (hl, hr), (wl, wr)))
        z = y.reshape(N, C, i, h, i, w).max(axis=(3, 5))
        pieces.append(z.reshape(N, -1))
    return jnp.concatenate(pieces, axis=1)


if __name__ == "__main__":
    key = jax.random.PRNGKey(0)
    N, C, H, W = 2, 4, 16, 16
    num_levels = 3

    x = jax.random.normal(key, (N, C, H, W), dtype=jnp.float32)

    out = spp_layer_pallas(x, num_levels)
    out = jax.block_until_ready(out)

    ref = spp_layer_ref(x, num_levels)
    total = sum(i * i for i in range(1, num_levels + 1))
    assert out.shape == (N, C * total), out.shape
    assert jnp.allclose(out, ref, atol=1e-6, rtol=1e-6), "mismatch vs reference"

    print("KERNEL_OK")
</pallas_src>

<mosaic_0001>
module attributes {stable_mosaic.version = 11 : i64} {
  func.func @kernel(%arg0: i32, %arg1: i32, %arg2: memref<1x4x16x16xf32, #tpu.memory_space<vmem>>, %arg3: memref<1x4x14xf32, #tpu.memory_space<vmem>>) attributes {dimension_semantics = [#tpu.dimension_semantics<parallel>, #tpu.dimension_semantics<parallel>], iteration_bounds = array<i64: 2, 1>, scalar_prefetch = 0 : i64, scratch_operands = 0 : i64, tpu.core_type = #tpu.core_type<tc>, window_params = [{transform_indices = @transform_0, window_bounds = array<i64: 1, 4, 16, 16>}, {transform_indices = @transform_1, window_bounds = array<i64: 1, 4, 14>}]} {
    %c0 = arith.constant 0 : index
    %c0_0 = arith.constant 0 : index
    %c0_1 = arith.constant 0 : index
    %c0_2 = arith.constant 0 : index
    %0 = vector.load %arg2[%c0, %c0_0, %c0_1, %c0_2] : memref<1x4x16x16xf32, #tpu.memory_space<vmem>>, vector<1x4x5x16xf32>
    %1 = vector.shape_cast %0 : vector<1x4x5x16xf32> to vector<4x5x16xf32>
    %cst = arith.constant dense<0xFF800000> : vector<4x16xf32>
    %2 = vector.multi_reduction <maximumf>, %1, %cst [1] : vector<4x5x16xf32> to vector<4x16xf32>
    %c0_3 = arith.constant 0 : index
    %c0_4 = arith.constant 0 : index
    %c5 = arith.constant 5 : index
    %c0_5 = arith.constant 0 : index
    %3 = vector.load %arg2[%c0_3, %c0_4, %c5, %c0_5] : memref<1x4x16x16xf32, #tpu.memory_space<vmem>>, vector<1x4x3x16xf32>
    %4 = vector.shape_cast %3 : vector<1x4x3x16xf32> to vector<4x3x16xf32>
    %cst_6 = arith.constant dense<0xFF800000> : vector<4x16xf32>
    %5 = vector.multi_reduction <maximumf>, %4, %cst_6 [1] : vector<4x3x16xf32> to vector<4x16xf32>
    %c0_7 = arith.constant 0 : index
    %c0_8 = arith.constant 0 : index
    %c8 = arith.constant 8 : index
    %c0_9 = arith.constant 0 : index
    %6 = vector.load %arg2[%c0_7, %c0_8, %c8, %c0_9] : memref<1x4x16x16xf32, #tpu.memory_space<vmem>>, vector<1x4x3x16xf32>
    %7 = vector.shape_cast %6 : vector<1x4x3x16xf32> to vector<4x3x16xf32>
    %cst_10 = arith.constant dense<0xFF800000> : vector<4x16xf32>
    %8 = vector.multi_reduction <maximumf>, %7, %cst_10 [1] : vector<4x3x16xf32> to vector<4x16xf32>
    %c0_11 = arith.constant 0 : index
    %c0_12 = arith.constant 0 : index
    %c11 = arith.constant 11 : index
    %c0_13 = arith.constant 0 : index
    %9 = vector.load %arg2[%c0_11, %c0_12, %c11, %c0_13] : memref<1x4x16x16xf32, #tpu.memory_space<vmem>>, vector<1x4x5x16xf32>
    %10 = vector.shape_cast %9 : vector<1x4x5x16xf32> to vector<4x5x16xf32>
    %cst_14 = arith.constant dense<0xFF800000> : vector<4x16xf32>
    %11 = vector.multi_reduction <maximumf>, %10, %cst_14 [1] : vector<4x5x16xf32> to vector<4x16xf32>
    %12 = arith.maximumf %2, %5 : vector<4x16xf32>
    %13 = arith.maximumf %12, %8 : vector<4x16xf32>
    %14 = arith.maximumf %13, %11 : vector<4x16xf32>
    %cst_15 = arith.constant dense<0xFF800000> : vector<4xf32>
    %15 = vector.multi_reduction <maximumf>, %14, %cst_15 [1] : vector<4x16xf32> to vector<4xf32>
    %16 = vector.shape_cast %15 : vector<4xf32> to vector<4x1xf32>
    %17 = arith.maximumf %2, %5 : vector<4x16xf32>
    %18 = vector.extract_strided_slice %17 {offsets = [0, 0], sizes = [4, 8], strides = [1, 1]} : vector<4x16xf32> to vector<4x8xf32>
    %cst_16 = arith.constant dense<0xFF800000> : vector<4xf32>
    %19 = vector.multi_reduction <maximumf>, %18, %cst_16 [1] : vector<4x8xf32> to vector<4xf32>
    %20 = vector.shape_cast %19 : vector<4xf32> to vector<4x1xf32>
    %21 = vector.extract_strided_slice %17 {offsets = [0, 8], sizes = [4, 8], strides = [1, 1]} : vector<4x16xf32> to vector<4x8xf32>
    %cst_17 = arith.constant dense<0xFF800000> : vector<4xf32>
    %22 = vector.multi_reduction <maximumf>, %21, %cst_17 [1] : vector<4x8xf32> to vector<4xf32>
    %23 = vector.shape_cast %22 : vector<4xf32> to vector<4x1xf32>
    %24 = arith.maximumf %8, %11 : vector<4x16xf32>
    %25 = vector.extract_strided_slice %24 {offsets = [0, 0], sizes = [4, 8], strides = [1, 1]} : vector<4x16xf32> to vector<4x8xf32>
    %cst_18 = arith.constant dense<0xFF800000> : vector<4xf32>
    %26 = vector.multi_reduction <maximumf>, %25, %cst_18 [1] : vector<4x8xf32> to vector<4xf32>
    %27 = vector.shape_cast %26 : vector<4xf32> to vector<4x1xf32>
    %28 = vector.extract_strided_slice %24 {offsets = [0, 8], sizes = [4, 8], strides = [1, 1]} : vector<4x16xf32> to vector<4x8xf32>
    %cst_19 = arith.constant dense<0xFF800000> : vector<4xf32>
    %29 = vector.multi_reduction <maximumf>, %28, %cst_19 [1] : vector<4x8xf32> to vector<4xf32>
    %30 = vector.shape_cast %29 : vector<4xf32> to vector<4x1xf32>
    %31 = vector.extract_strided_slice %2 {offsets = [0, 0], sizes = [4, 5], strides = [1, 1]} : vector<4x16xf32> to vector<4x5xf32>
    %cst_20 = arith.constant dense<0xFF800000> : vector<4xf32>
    %32 = vector.multi_reduction <maximumf>, %31, %cst_20 [1] : vector<4x5xf32> to vector<4xf32>
    %33 = vector.shape_cast %32 : vector<4xf32> to vector<4x1xf32>
    %cst_21 = arith.constant 0.000000e+00 : f32
    %34 = vector.broadcast %cst_21 : f32 to vector<4x1xf32>
    %35 = arith.maximumf %33, %34 : vector<4x1xf32>
    %36 = vector.extract_strided_slice %2 {offsets = [0, 5], sizes = [4, 6], strides = [1, 1]} : vector<4x16xf32> to vector<4x6xf32>
    %cst_22 = arith.constant dense<0xFF800000> : vector<4xf32>
    %37 = vector.multi_reduction <maximumf>, %36, %cst_22 [1] : vector<4x6xf32> to vector<4xf32>
    %38 = vector.shape_cast %37 : vector<4xf32> to vector<4x1xf32>
    %cst_23 = arith.constant 0.000000e+00 : f32
    %39 = vector.broadcast %cst_23 : f32 to vector<4x1xf32>
    %40 = arith.maximumf %38, %39 : vector<4x1xf32>
    %41 = vector.extract_strided_slice %2 {offsets = [0, 11], sizes = [4, 5], strides = [1, 1]} : vector<4x16xf32> to vector<4x5xf32>
    %cst_24 = arith.constant dense<0xFF800000> : vector<4xf32>
    %42 = vector.multi_reduction <maximumf>, %41, %cst_24 [1] : vector<4x5xf32> to vector<4xf32>
    %43 = vector.shape_cast %42 : vector<4xf32> to vector<4x1xf32>
    %cst_25 = arith.constant 0.000000e+00 : f32
    %44 = vector.broadcast %cst_25 : f32 to vector<4x1xf32>
    %45 = arith.maximumf %43, %44 : vector<4x1xf32>
    %46 = arith.maximumf %5, %8 : vector<4x16xf32>
    %47 = vector.extract_strided_slice %46 {offsets = [0, 0], sizes = [4, 5], strides = [1, 1]} : vector<4x16xf32> to vector<4x5xf32>
    %cst_26 = arith.constant dense<0xFF800000> : vector<4xf32>
    %48 = vector.multi_reduction <maximumf>, %47, %cst_26 [1] : vector<4x5xf32> to vector<4xf32>
    %49 = vector.shape_cast %48 : vector<4xf32> to vector<4x1xf32>
    %cst_27 = arith.constant 0.000000e+00 : f32
    %50 = vector.broadcast %cst_27 : f32 to vector<4x1xf32>
    %51 = arith.maximumf %49, %50 : vector<4x1xf32>
    %52 = vector.extract_strided_slice %46 {offsets = [0, 5], sizes = [4, 6], strides = [1, 1]} : vector<4x16xf32> to vector<4x6xf32>
    %cst_28 = arith.constant dense<0xFF800000> : vector<4xf32>
    %53 = vector.multi_reduction <maximumf>, %52, %cst_28 [1] : vector<4x6xf32> to vector<4xf32>
    %54 = vector.shape_cast %53 : vector<4xf32> to vector<4x1xf32>
    %55 = vector.extract_strided_slice %46 {offsets = [0, 11], sizes = [4, 5], strides = [1, 1]} : vector<4x16xf32> to vector<4x5xf32>
    %cst_29 = arith.constant dense<0xFF800000> : vector<4xf32>
    %56 = vector.multi_reduction <maximumf>, %55, %cst_29 [1] : vector<4x5xf32> to vector<4xf32>
    %57 = vector.shape_cast %56 : vector<4xf32> to vector<4x1xf32>
    %cst_30 = arith.constant 0.000000e+00 : f32
    %58 = vector.broadcast %cst_30 : f32 to vector<4x1xf32>
    %59 = arith.maximumf %57, %58 : vector<4x1xf32>
    %60 = vector.extract_strided_slice %11 {offsets = [0, 0], sizes = [4, 5], strides = [1, 1]} : vector<4x16xf32> to vector<4x5xf32>
    %cst_31 = arith.constant dense<0xFF800000> : vector<4xf32>
    %61 = vector.multi_reduction <maximumf>, %60, %cst_31 [1] : vector<4x5xf32> to vector<4xf32>
    %62 = vector.shape_cast %61 : vector<4xf32> to vector<4x1xf32>
    %cst_32 = arith.constant 0.000000e+00 : f32
    %63 = vector.broadcast %cst_32 : f32 to vector<4x1xf32>
    %64 = arith.maximumf %62, %63 : vector<4x1xf32>
    %65 = vector.extract_strided_slice %11 {offsets = [0, 5], sizes = [4, 6], strides = [1, 1]} : vector<4x16xf32> to vector<4x6xf32>
    %cst_33 = arith.constant dense<0xFF800000> : vector<4xf32>
    %66 = vector.multi_reduction <maximumf>, %65, %cst_33 [1] : vector<4x6xf32> to vector<4xf32>
    %67 = vector.shape_cast %66 : vector<4xf32> to vector<4x1xf32>
    %cst_34 = arith.constant 0.000000e+00 : f32
    %68 = vector.broadcast %cst_34 : f32 to vector<4x1xf32>
    %69 = arith.maximumf %67, %68 : vector<4x1xf32>
    %70 = vector.extract_strided_slice %11 {offsets = [0, 11], sizes = [4, 5], strides = [1, 1]} : vector<4x16xf32> to vector<4x5xf32>
    %cst_35 = arith.constant dense<0xFF800000> : vector<4xf32>
    %71 = vector.multi_reduction <maximumf>, %70, %cst_35 [1] : vector<4x5xf32> to vector<4xf32>
    %72 = vector.shape_cast %71 : vector<4xf32> to vector<4x1xf32>
    %cst_36 = arith.constant 0.000000e+00 : f32
    %73 = vector.broadcast %cst_36 : f32 to vector<4x1xf32>
    %74 = arith.maximumf %72, %73 : vector<4x1xf32>
    %75 = tpu.concatenate %16, %20, %23, %27, %30, %35, %40, %45, %51, %54, %59, %64, %69, %74 in 1 : vector<4x1xf32>, vector<4x1xf32>, vector<4x1xf32>, vector<4x1xf32>, vector<4x1xf32>, vector<4x1xf32>, vector<4x1xf32>, vector<4x1xf32>, vector<4x1xf32>, vector<4x1xf32>, vector<4x1xf32>, vector<4x1xf32>, vector<4x1xf32>, vector<4x1xf32> -> vector<4x14xf32>
    %c0_37 = arith.constant 0 : index
    %c0_38 = arith.constant 0 : index
    %c0_39 = arith.constant 0 : index
    %76 = vector.load %arg3[%c0_37, %c0_38, %c0_39] : memref<1x4x14xf32, #tpu.memory_space<vmem>>, vector<1x4x14xf32>
    %77 = vector.shape_cast %76 : vector<1x4x14xf32> to vector<4x14xf32>
    %78 = vector.shape_cast %75 : vector<4x14xf32> to vector<1x4x14xf32>
    tpu.vector_store %arg3[%c0_37, %c0_38, %c0_39], %78 {strides = array<i32>} : memref<1x4x14xf32, #tpu.memory_space<vmem>>, vector<1x4x14xf32>,
    return
  }
  func.func @transform_0(%arg0: i32, %arg1: i32) -> (i32, i32, i32, i32) {
    %c0_i32 = arith.constant 0 : i32
    %c0_i32_0 = arith.constant 0 : i32
    %c0_i32_1 = arith.constant 0 : i32
    return %arg0, %arg1, %c0_i32, %c0_i32_0 : i32, i32, i32, i32
  }
  func.func @transform_1(%arg0: i32, %arg1: i32) -> (i32, i32, i32) {
    %c0_i32 = arith.constant 0 : i32
    %c0_i32_0 = arith.constant 0 : i32
    return %arg0, %arg1, %c0_i32 : i32, i32, i32
  }
}

</mosaic_0001>

<bundles_post_ra>
// kernel: tpu_custom_call.1
= control target key start
LH: loop header
LB: loop body
LE: loop exit
PB: predicated region body
PF: predicated region fallthrough
CT: control target
= control target key end

     0   :  { %6 = vsyncpa [#allocation3], 0  ;;  %s1015_s0 = inlined_call_operand.hbm [shape: f32[2,4,16,16], index: 0, kind: input, shape index: {}]   ;;  %s1016_s1 = inlined_call_operand.hbm [shape: f32[2,4,14], index: 1, kind: output, shape index: {}]  }
   0x1   :  { %8 = vsyncpa [#allocation3 + $0x1], 0 }
   0x2   :  { %9 = vsyncpa [#allocation4], 0 }
   0x3   :  { %11 = vsyncpa [#allocation4 + $0x1], 0  ;;  %s744_s6 = smov 0   ;;  %s746_s7 = smov 0  }
   0x4   :  { %s748_s8 = smov 0   ;;  %s750_s9 = smov 0  }
   0x5   :  { %s752_s10 = smov 0   ;;  %s754_s11 = smov 0  }
   0x6 LB: > { %s537_s12 = sadd.s32 4294967295, %s728_s11   ;;  %s538_s13 = sadd.s32 4294967294, %s728_s11   ;;  %s728_s11 = sphi %s754_s11, %s17_s11   ;;  %s724_s10 = sphi %s752_s10, %s1031_s10   ;;  %s720_s9 = sphi %s750_s9, %s1030_s9   ;;  %s716_s8 = sphi %s748_s8, %s1029_s8   ;;  %s712_s7 = sphi %s746_s7, %s1028_s7   ;;  %s708_s6 = sphi %s744_s6, %s1027_s6  }
   0x7   : > { %s29_s14 = sadd.s32 1, %s724_s10  ;;  %s38_s15 = sadd.s32 1, %s716_s8 }
   0x8   : > { %p31_p0 = scmp.ge.s32.totalorder %s29_s14, 2  ;;  %p45_p1 = scmp.ne.s32.totalorder %s716_s8, %s712_s7 }
   0x9   : > { %p46_p2 = scmp.eq.s32.totalorder %s728_s11, 0  ;;  %p51_p3 = scmp.ne.s32.totalorder %s712_s7, %s708_s6 }
   0xa   : > { %s1033_s14 = smov (%p31_p0, %s29_s14), 0  ;;  %p52_p5 = scmp.eq.s32.totalorder %s537_s12, 0 }
   0xb   : > { %p785_p4 = por %p46_p2, %p45_p1  ;;  %s33_s17 = ssub.s32 %s724_s10, %s1033_s14 }
   0xc   : > { %p77_p6 = scmp.eq.s32.totalorder %s537_s12, 1  ;;  %p36_p7 = scmp.eq.s32.totalorder %s33_s17, 0 }
   0xd   : > { %p791_p8 = por %p52_p5, %p51_p3  ;;  %p83_p10 = scmp.eq.s32.totalorder %s538_s13, 1 }
   0xe   : > { %p795_p9 = por %p77_p6, %p45_p1  ;;  %p564_p13 = scmp.lt.s32.totalorder %s728_s11, 2 }
   0xf   : > { %s800_s20 = scalar_select %p36_p7, %s716_s8, %s38_s15  }
  0x10   : > { %s1020_s19 = scalar_select %p795_p9, 1, 0 }
  0x11   : > { %p802_p11 = por %p83_p10, %p51_p3  ;;  %s103_s22 = sand.u32 1, %s716_s8  }
  0x12   : > { %s541_s23 = sshll.u32 %s103_s22, 6  ;;  %s551_s24 = sshll.u32 %s724_s10, 10 }
  0x13   : > { %s1021_s21 = scalar_select %p802_p11, 1, 0 }
  0x14   : > { %s813_s27 = scalar_lea.hbm %s1015_s0, %s551_s24  ;;  %s107_s28 = scalar_lea.vmem [#allocation2], %s541_s23 }
  0x15   : > { %s117_s29 = sshll.u32 %s107_s28, 4  ;;  %p819_p0 = pnand %p564_p13, %p785_p4  ;;  %s815_s29 = int_to_ptr.vmem [resolvable:$true] %s117_s29 }
  0x16   : > { %s824_s2 = scalar_lea.sflag [#allocation3], %s103_s22  ;;  %s616_s3 = scalar_lea.hbm %s813_s27, 1024 }
  0x17   : > { %p617_p2 = scmp.ne.s32.totalorder %s813_s27, %s616_s3  ;;  %p618_p3 = pneg %p819_p0 }
  0x18   : > { %s621_s12 = scalar_lea.hbm %s1015_s0, 2048  ;;  %p622_p4 = scmp.lt.u32.totalorder %s813_s27, %s1015_s0 }
  0x19   : > { %p619_p5 = pnand %p618_p3, %p617_p2  ;;  %p623_p7 = scmp.lt.u32.totalorder %s621_s12, %s616_s3 }
  0x1a   : > { %p625_p13 = scmp.lt.u32.totalorder %s616_s3, %s813_s27 }
  0x1b   : > { %p620_p6 = pneg %p619_p5  ;;  %p624_p10 = por %p623_p7, %p622_p4 }
  0x1d   : > { %p626_p12 = por %p625_p13, %p624_p10 }
  0x1f   : > { %p627_p1 = pnand %p626_p12, %p620_p6 }
  0x21   : > { %630 = shalt.err (!%p627_p1)
}
  0x22   : > { %s631_s16 = scalar_lea.vmem %s815_s29, 1024  ;;  %s730_s17 = smov [#allocation2]  }
  0x23   : > { %p632_p2 = scmp.ne.s32.totalorder %s815_s29, %s631_s16  ;;  %s636_s22 = sshll.u32 %s730_s17, 4  ;;  %s637_s22 = int_to_ptr.vmem [resolvable:$false] %s636_s22 }
  0x24   : > { %s638_s23 = scalar_lea.vmem %s637_s22, 2048  ;;  %p639_p9 = scmp.lt.s32.totalorder %s815_s29, %s637_s22 }
  0x25   : > { %p634_p5 = pnand %p632_p2, %p618_p3  ;;  %p640_p4 = scmp.lt.s32.totalorder %s638_s23, %s631_s16 }
  0x27   : > { %p635_p11 = pneg %p634_p5  ;;  %p641_p7 = por %p640_p4, %p639_p9 }
  0x29   : > { %p642_p10 = pnand %p641_p7, %p635_p11 }
  0x2b   : > { %645 = shalt.err (!%p642_p10)
}
  0x2c   : > { %s731_s24 = smov 128   ;;  %s732_s25 = smov 8  }
  0x2d   : > { %559 = dma.hbm_to_vmem [thread:$0]  (!%p819_p0), %s813_s27, 1024, %s815_s29, %s824_s2, %s731_s24, %s731_s24, %s732_s25  }
  0x2e   : > { %p125_p12 = scmp.lt.s32.totalorder %s728_s11, 3  ;;  %p1023_p1 = scmp.ge.s32.totalorder %s728_s11, 1 }
  0x30   : > { %p126_p3 = pnand %p1023_p1, %p125_p12 }
  0x31   : > { %s856_s26 = sand.u32 (!%p126_p3), 1, %s712_s7  }
  0x32   : > { %129 = sbr.rel (%p126_p3) target bundleno = 278 (0x116), region = 24  ;;  %s545_s28 = sshll.u32 (!%p126_p3), %s856_s26, 6 }
  0x33   : > { %s132_s3 = scalar_lea.sflag (!%p126_p3), [#allocation3], %s856_s26  ;;  %s860_s4 = scalar_lea.vmem (!%p126_p3), [#allocation2], %s545_s28 }
  0x39   : > { %699 = dma.done.wait (%p791_p8), %s132_s3, 1024  }
  0x3a   : > { %701 = vsyncadd (%p791_p8), %s132_s3, 4294966272  ;;  %vm159_vm0 = vcmask 126976   ;;  %vm192_vm1 = vcmask 124928   ;;  %v155_v0 = vld [vmem:[%s860_s4] sm:$0x1f]  ;;  %vm301_vm2 = vcmask 1041409  }
  0x3b   : > { %v156_v1 = vld [vmem:[%s860_s4 + $0x10] sm:$0x1f]  ;;  %v157_v2 = vld [vmem:[%s860_s4 + $0x20] sm:$0x1f]  ;;  %v160_v4 = vsel %vm159_vm0, %v155_v0, -inf  ;;  %vm303_vm3 = vcmask 1042434  }
  0x3c   : > { %v158_v3 = vld [vmem:[%s860_s4 + $0x30] sm:$0x1f]  ;;  %v167_v5 = vsel %vm159_vm0, %v156_v1, -inf  ;;  %v174_v6 = vsel %vm159_vm0, %v157_v2, -inf  ;;  %v161_v7 = vrot.slane %v160_v4, 4  ;;  %vm305_vm4 = vcmask 1043459  }
  0x3d   : > { %v168_v8 = vrot.slane %v167_v5, 4  ;;  %v175_v9 = vrot.slane %v174_v6, 4  ;;  %v181_v10 = vsel %vm159_vm0, %v158_v3, -inf  ;;  %v188_v11 = vld [vmem:[%s860_s4 + $0x5] sm:$0x7]  ;;  %vm364_vm5 = vcmask 126040  }
  0x3e   : > { %v182_v12 = vrot.slane %v181_v10, 4  ;;  %v189_v13 = vld [vmem:[%s860_s4 + $0x15] sm:$0x7]  ;;  %v190_v14 = vld [vmem:[%s860_s4 + $0x25] sm:$0x7]  ;;  %v193_v15 = vsel %vm192_vm1, %v188_v11, -inf  ;;  %v162_v16 = vmax.f32 %v160_v4, %v161_v7 }
  0x3f   : > { %v169_v17 = vmax.f32 %v167_v5, %v168_v8  ;;  %v176_v18 = vmax.f32 %v174_v6, %v175_v9  ;;  %v191_v19 = vld [vmem:[%s860_s4 + $0x35] sm:$0x7]  ;;  %v194_v20 = vrot.slane %v193_v15, 4  ;;  %v200_v22 = vsel %vm192_vm1, %v189_v13, -inf  ;;  %v221_v45 = vld [vmem:[%s860_s4 + $0x8] sm:$0x7] }
  0x40   : > { %v183_v21 = vmax.f32 %v181_v10, %v182_v12  ;;  %v207_v23 = vsel %vm192_vm1, %v190_v14, -inf  ;;  %v214_v24 = vsel %vm192_vm1, %v191_v19, -inf  ;;  %v163_v25 = vrot.slane %v162_v16, 2  ;;  %v222_v50 = vld [vmem:[%s860_s4 + $0x18] sm:$0x7]  ;;  %s546_s18 = sshll.u32 %s856_s26, 2 }
  0x41   : > { %v170_v26 = vrot.slane %v169_v17, 2  ;;  %v177_v27 = vrot.slane %v176_v18, 2  ;;  %vm354_vm6 = vcmask 35840   ;;  %vm359_vm7 = vcmask 85032   ;;  %v223_v3 = vld [vmem:[%s860_s4 + $0x28] sm:$0x7] }
  0x42   : > { %v195_v28 = vmax.f32 %v193_v15, %v194_v20  ;;  %v184_v29 = vrot.slane %v183_v21, 2  ;;  %v201_v30 = vrot.slane %v200_v22, 4  ;;  %v208_v31 = vrot.slane %v207_v23, 4  ;;  %v224_v6 = vld [vmem:[%s860_s4 + $0x38] sm:$0x7]  ;;  %s548_s27 = sshll.u32 %s720_s9, 6 }
  0x43   : > { %v215_v32 = vrot.slane %v214_v24, 4  ;;  %v164_v33 = vmax.f32 %v162_v16, %v163_v25  ;;  %v171_v34 = vmax.f32 %v169_v17, %v170_v26  ;;  %v178_v35 = vmax.f32 %v176_v18, %v177_v27  ;;  %v253_v17 = vld [vmem:[%s860_s4 + $0xb] sm:$0x1f]  ;;  %v254_v26 = vld [vmem:[%s860_s4 + $0x1b] sm:$0x1f]  ;;  %s153_s29 = scalar_lea.vmem [#allocation5], %s546_s18  ;;  %s966_s12 = scalar_lea.hbm %s1016_s1, %s548_s27 }
  0x44   : > { %v196_v36 = vrot.slane %v195_v28, 2  ;;  %v185_v37 = vmax.f32 %v183_v21, %v184_v29  ;;  %v202_v38 = vmax.f32 %v200_v22, %v201_v30  ;;  %v209_v39 = vmax.f32 %v207_v23, %v208_v31  ;;  %s455_s30 = sshll.u32 %s153_s29, 4  ;;  %s441_s9 = scalar_lea.sflag [#allocation4], %s856_s26  ;;  %s968_s30 = int_to_ptr.vmem [resolvable:$true] %s455_s30 }
  0x45   : > { %v216_v40 = vmax.f32 %v214_v24, %v215_v32  ;;  %v165_v41 = vrot.slane %v164_v33, 1  ;;  %v172_v42 = vrot.slane %v171_v34, 1  ;;  %v179_v43 = vrot.slane %v178_v35, 1  ;;  %s646_s13 = scalar_lea.vmem %s968_s30, 64  ;;  %p1024_p9 = scmp.ne.s32.totalorder %s1020_s19, 0 }
  0x46   : > { %v197_v44 = vmax.f32 %v195_v28, %v196_v36  ;;  %v186_v46 = vrot.slane %v185_v37, 1  ;;  %v203_v47 = vrot.slane %v202_v38, 2  ;;  %v210_v48 = vrot.slane %v209_v39, 2  ;;  %p647_p8 = scmp.ne.s32.totalorder %s968_s30, %s646_s13  ;;  %s733_s15 = smov [#allocation5]  }
  0x47   : > { %v217_v49 = vrot.slane %v216_v40, 2  ;;  %v166_v51 = vmax.f32 %v164_v33, %v165_v41  ;;  %v173_v52 = vmax.f32 %v171_v34, %v172_v42  ;;  %v180_v53 = vmax.f32 %v178_v35, %v179_v43  ;;  %v255_v34 = vld [vmem:[%s860_s4 + $0x2b] sm:$0x1f]  ;;  %v256_v42 = vld [vmem:[%s860_s4 + $0x3b] sm:$0x1f]  ;;  %s650_s16 = sshll.u32 %s733_s15, 4  ;;  %s651_s16 = int_to_ptr.vmem [resolvable:$false] %s650_s16 }
  0x48   : > { %v198_v54 = vrot.slane %v197_v44, 1  ;;  %v187_v55 = vmax.f32 %v185_v37, %v186_v46  ;;  %v204_v56 = vmax.f32 %v202_v38, %v203_v47  ;;  %v211_v57 = vmax.f32 %v209_v39, %v210_v48  ;;  %p648_p11 = pnand %p647_p8, %p1024_p9  ;;  %s652_s17 = scalar_lea.vmem %s651_s16, 128 }
  0x49   : > { %v218_v58 = vmax.f32 %v216_v40, %v217_v49  ;;  %vm324_vm8 = vcmask 126016   ;;  %v350_v59 = vsel %vm301_vm2, %v173_v52, %v166_v51  ;;  %v225_v61 = vsel %vm192_vm1, %v221_v45, -inf  ;;  %p653_p6 = scmp.lt.s32.totalorder %s968_s30, %s651_s16  ;;  %p654_p13 = scmp.lt.s32.totalorder %s652_s17, %s646_s13 }
  0x4a   : > { %v885_v60 = vmax.f32 %v197_v44, %v198_v54  ;;  %v232_v62 = vsel %vm192_vm1, %v222_v50, -inf  ;;  %v351_v63 = vsel %vm303_vm3, %v180_v53, %v350_v59  ;;  %v205_v0 = vrot.slane %v204_v56, 1  ;;  %p649_p0 = pneg %p648_p11 }
  0x4b   : > { %v212_v1 = vrot.slane %v211_v57, 1  ;;  %v219_v2 = vrot.slane %v218_v58, 1  ;;  %v352_v4 = vsel %vm305_vm4, %v187_v55, %v351_v63  ;;  %v226_v7 = vrot.slane %v225_v61, 4  ;;  %p655_p2 = por %p654_p13, %p653_p6 }
  0x4c   : > { %v893_v5 = vmax.f32 %v166_v51, %v885_v60  ;;  %v233_v8 = vrot.slane %v232_v62, 4  ;;  %v365_v9 = vsel %vm364_vm5, %v352_v4, -inf  ;;  %v355_v10 = vsel %vm354_vm6, %v352_v4, -inf }
  0x4d   : > { %v360_v11 = vsel %vm359_vm7, %v352_v4, -inf  ;;  %v899_v12 = vmax.f32 %v204_v56, %v205_v0  ;;  %366 = vmax.xlane.f32.xlu1 %v365_v9  ;;  %356 = vmax.xlane.f32.xlu0 %v355_v10  ;;  %v901_v13 = vmax.f32 %v211_v57, %v212_v1  ;;  %v903_v14 = vmax.f32 %v218_v58, %v219_v2  ;;  %p656_p5 = pnand %p655_p2, %p649_p0 }
  0x4e   : > { %v227_v15 = vmax.f32 %v225_v61, %v226_v7  ;;  %v239_v16 = vsel %vm192_vm1, %v223_v3, -inf  ;;  %v234_v19 = vmax.f32 %v232_v62, %v233_v8  ;;  %v246_v21 = vsel %vm192_vm1, %v224_v6, -inf }
  0x4f   : > { %v908_v18 = vmax.f32 %v173_v52, %v899_v12  ;;  %v240_v20 = vrot.slane %v239_v16, 4  ;;  %v912_v22 = vmax.f32 %v180_v53, %v901_v13  ;;  %v915_v23 = vmax.f32 %v187_v55, %v903_v14 }
  0x50   : > { %v228_v24 = vrot.slane %v227_v15, 2  ;;  %v247_v25 = vrot.slane %v246_v21, 4  ;;  %v235_v28 = vrot.slane %v234_v19, 2  ;;  %v257_v30 = vsel %vm159_vm0, %v253_v17, -inf }
  0x51   : > { %v316_v27 = vsel %vm301_vm2, %v908_v18, %v893_v5  ;;  %v241_v29 = vmax.f32 %v239_v16, %v240_v20  ;;  %361 = vmax.xlane.f32.xlu0 %v360_v11  ;;  %v258_v35 = vrot.slane %v257_v30, 4  ;;  %v264_v39 = vsel %vm159_vm0, %v254_v26, -inf }
  0x52   : > { %v317_v31 = vsel %vm303_vm3, %v912_v22, %v316_v27  ;;  %v229_v32 = vmax.f32 %v227_v15, %v228_v24  ;;  %v248_v33 = vmax.f32 %v246_v21, %v247_v25  ;;  %v236_v37 = vmax.f32 %v234_v19, %v235_v28 }
  0x53   : > { %v318_v36 = vsel %vm305_vm4, %v915_v23, %v317_v31  ;;  %v242_v38 = vrot.slane %v241_v29, 2  ;;  %v259_v43 = vmax.f32 %v257_v30, %v258_v35  ;;  %v265_v46 = vrot.slane %v264_v39, 4 }
  0x54   : > { %v325_v40 = vsel %vm324_vm8, %v318_v36, -inf  ;;  %v249_v41 = vrot.slane %v248_v33, 2  ;;  %v230_v44 = vrot.slane %v229_v32, 1  ;;  %v271_v47 = vsel %vm159_vm0, %v255_v34, -inf }
  0x55   : > { %326 = vmax.xlane.f32.xlu1 %v325_v40  ;;  %v243_v45 = vmax.f32 %v241_v29, %v242_v38  ;;  %v260_v49 = vrot.slane %v259_v43, 2  ;;  %v272_v50 = vrot.slane %v271_v47, 4  ;;  %vm320_vm9 = vcmask 60416  }
  0x56   : > { %v250_v48 = vmax.f32 %v248_v33, %v249_v41  ;;  %v237_v51 = vrot.slane %v236_v37, 1  ;;  %v266_v53 = vmax.f32 %v264_v39, %v265_v46  ;;  %v278_v54 = vsel %vm159_vm0, %v256_v42, -inf }
  0x57   : > { %v244_v52 = vrot.slane %v243_v45, 1  ;;  %v261_v55 = vmax.f32 %v259_v43, %v260_v49  ;;  %v273_v56 = vmax.f32 %v271_v47, %v272_v50  ;;  %v279_v57 = vrot.slane %v278_v54, 4 }
  0x58   : > { %v231_v58 = vmax.f32 %v229_v32, %v230_v44  ;;  %v267_v59 = vrot.slane %v266_v53, 2  ;;  %v321_v61 = vsel %vm320_vm9, %v318_v36, -inf  ;;  %v251_v62 = vrot.slane %v250_v48, 1 }
  0x59   : > { %v262_v63 = vrot.slane %v261_v55, 1  ;;  %v274_v0 = vrot.slane %v273_v56, 2  ;;  %v280_v1 = vmax.f32 %v278_v54, %v279_v57  ;;  %322 = vmax.xlane.f32.xlu0 %v321_v61  ;;  %v238_v2 = vmax.f32 %v236_v37, %v237_v51 }
  0x5a   : > { %v245_v3 = vmax.f32 %v243_v45, %v244_v52  ;;  %v268_v4 = vmax.f32 %v266_v53, %v267_v59  ;;  %v289_v6 = vmax.f32 %v893_v5, %v231_v58  ;;  %v369_v10 = vmax.f32 %v885_v60, %v231_v58 }
  0x5b   : > { %v263_v7 = vmax.f32 %v261_v55, %v262_v63  ;;  %v275_v8 = vmax.f32 %v273_v56, %v274_v0  ;;  %v281_v9 = vrot.slane %v280_v1, 2  ;;  %v290_v15 = vmax.f32 %v908_v18, %v238_v2 }
  0x5c   : > { %v269_v11 = vrot.slane %v268_v4, 1  ;;  %v370_v16 = vmax.f32 %v899_v12, %v238_v2  ;;  %v252_v17 = vmax.f32 %v250_v48, %v251_v62  ;;  %v291_v21 = vmax.f32 %v912_v22, %v245_v3 }
  0x5d   : > { %v276_v19 = vrot.slane %v275_v8, 1  ;;  %v282_v20 = vmax.f32 %v280_v1, %v281_v9  ;;  %v328_v25 = vmax.f32 %v231_v58, %v263_v7  ;;  %v293_v26 = vmax.f32 %v289_v6, %v263_v7 }
  0x5e   : > { %v270_v24 = vmax.f32 %v268_v4, %v269_v11  ;;  %v371_v5 = vmax.f32 %v901_v13, %v245_v3  ;;  %v292_v29 = vmax.f32 %v915_v23, %v252_v17  ;;  %v377_v60 = vsel %vm301_vm2, %v370_v16, %v369_v10 }
  0x5f   : > { %v277_v27 = vmax.f32 %v275_v8, %v276_v19  ;;  %v283_v28 = vrot.slane %v282_v20, 1  ;;  %v372_v33 = vmax.f32 %v903_v14, %v252_v17  ;;  %vm308_vm10 = vcmask 125952  }
  0x60   : > { %v329_v30 = vmax.f32 %v238_v2, %v270_v24  ;;  %v294_v18 = vmax.f32 %v290_v15, %v270_v24  ;;  %v378_v13 = vsel %vm303_vm3, %v371_v5, %v377_v60  ;;  %v396_v42 = vsel %vm301_vm2, %v270_v24, %v263_v7 }
  0x61   : > { %v284_v31 = vmax.f32 %v282_v20, %v283_v28  ;;  %v330_v12 = vmax.f32 %v245_v3, %v277_v27  ;;  %v295_v32 = vmax.f32 %v291_v21, %v277_v27  ;;  %v379_v40 = vsel %vm305_vm4, %v372_v33, %v378_v13 }
  0x62   : > { %v336_v22 = vsel %vm301_vm2, %v329_v30, %v328_v25  ;;  %v302_v34 = vsel %vm301_vm2, %v294_v18, %v293_v26  ;;  %v381_v44 = vsel %vm354_vm6, %v379_v40, -inf  ;;  %v397_v45 = vsel %vm303_vm3, %v277_v27, %v396_v42 }
  0x63   : > { %v331_v35 = vmax.f32 %v252_v17, %v284_v31  ;;  %v337_v36 = vsel %vm303_vm3, %v330_v12, %v336_v22  ;;  %v296_v23 = vmax.f32 %v292_v29, %v284_v31  ;;  %v304_v37 = vsel %vm303_vm3, %v295_v32, %v302_v34 }
  0x64   : > { %v388_v46 = vsel %vm364_vm5, %v379_v40, -inf  ;;  %v385_v47 = vsel %vm359_vm7, %v379_v40, -inf  ;;  %v398_v48 = vsel %vm305_vm4, %v284_v31, %v397_v45  ;;  %vm412_vm11 = vcmask 7168  }
  0x65   : > { %v338_v38 = vsel %vm305_vm4, %v331_v35, %v337_v36  ;;  %v306_v39 = vsel %vm305_vm4, %v296_v23, %v304_v37  ;;  %v400_v49 = vsel %vm354_vm6, %v398_v48, -inf  ;;  %v404_v50 = vsel %vm359_vm7, %v398_v48, -inf }
  0x66   : > { %v340_v14 = vsel %vm320_vm9, %v338_v38, -inf  ;;  %v309_v41 = vsel %vm308_vm10, %v306_v39, -inf  ;;  %v343_v43 = vsel %vm324_vm8, %v338_v38, -inf  ;;  %v408_v51 = vsel %vm364_vm5, %v398_v48, -inf }
  0x67   : > { %341 = vmax.xlane.f32.xlu1 %v340_v14  ;;  %310 = vmax.xlane.f32.xlu0 %v309_v41  ;;  %vm414_vm12 = vcmask 15360   ;;  %vm416_vm13 = vcmask 23552   ;;  %vm418_vm14 = vcmask 31744   ;;  %vm420_vm15 = vcmask 39936  }
  0x68   : > { %vm422_vm0 = vcmask 48128   ;;  %vm424_vm1 = vcmask 56320   ;;  %vm426_vm2 = vcmask 64512   ;;  %vm428_vm3 = vcmask 72704  }
  0x69   : > { %vm430_vm4 = vcmask 80896   ;;  %vm432_vm5 = vcmask 89088   ;;  %vm434_vm6 = vcmask 97280   ;;  %vm436_vm7 = vcmask 105472  }
  0x6a   : > { %vm438_vm8 = vcmask 109568  }
  0x6b   : > { %344 = vmax.xlane.f32.xlu1 %v343_v43  ;;  %382 = vmax.xlane.f32.xlu0 %v381_v44 }
  0x6f   : > { %389 = vmax.xlane.f32.xlu1 %v388_v46  ;;  %386 = vmax.xlane.f32.xlu0 %v385_v47 }
  0x73   : > { %401 = vmax.xlane.f32.xlu1 %v400_v49  ;;  %405 = vmax.xlane.f32.xlu0 %v404_v50 }
  0x77   : > { %409 = vmax.xlane.f32.xlu1 %v408_v51 }
  0xda   : > { %v357_v52 = vpop.xlane.xlu0 %356  ;;  %v367_v53 = vpop.xlane.xlu1 %366 }
  0xdb   : > { %v358_v63 = vmax.f32 %v357_v52, 0.0  ;;  %v368_v6 = vmax.f32 %v367_v53, 0.0 }
  0xde   : > { %v362_v54 = vpop.xlane.xlu0 %361 }
  0xdf   : > { %v363_v2 = vmax.f32 %v362_v54, 0.0 }
  0xe2   : > { %v327_v55 = vpop.xlane.xlu1 %326 }
  0xe6   : > { %v323_v56 = vpop.xlane.xlu0 %322 }
  0xf4   : > { %v342_v57 = vpop.xlane.xlu1 %341  ;;  %v311_v58 = vpop.xlane.xlu0 %310 }
  0xf5   : > { %v413_v59 = vsel %vm412_vm11, %v311_v58, %v323_v56 }
  0xf6   : > { %v415_v61 = vsel %vm414_vm12, %v413_v59, %v327_v55 }
  0xf7   : > { %v417_v62 = vsel %vm416_vm13, %v415_v61, %v342_v57 }
  0xf8   : > { %v345_v0 = vpop.xlane.xlu1 %344  ;;  %v383_v1 = vpop.xlane.xlu0 %382 }
  0xf9   : > { %v419_v3 = vsel %vm418_vm14, %v417_v62, %v345_v0  ;;  %v384_v4 = vmax.f32 %v383_v1, 0.0 }
  0xfa   : > { %v421_v7 = vsel %vm420_vm15, %v419_v3, %v358_v63 }
  0xfb   : > { %v423_v8 = vsel %vm422_vm0, %v421_v7, %v363_v2 }
  0xfc   : > { %v390_v9 = vpop.xlane.xlu1 %389  ;;  %v425_v10 = vsel %vm424_vm1, %v423_v8, %v368_v6  ;;  %v387_v11 = vpop.xlane.xlu0 %386 }
  0xfd   : > { %v427_v15 = vsel %vm426_vm2, %v425_v10, %v384_v4  ;;  %v391_v16 = vmax.f32 %v390_v9, 0.0 }
  0xfe   : > { %v429_v17 = vsel %vm428_vm3, %v427_v15, %v387_v11 }
  0xff   : > { %v431_v20 = vsel %vm430_vm4, %v429_v17, %v391_v16 }
 0x100   : > { %v402_v19 = vpop.xlane.xlu1 %401  ;;  %v406_v21 = vpop.xlane.xlu0 %405 }
 0x101   : > { %v403_v24 = vmax.f32 %v402_v19, 0.0  ;;  %v407_v25 = vmax.f32 %v406_v21, 0.0 }
 0x103   : > { %v433_v26 = vsel %vm432_vm5, %v431_v20, %v403_v24 }
 0x104   : > { %v435_v5 = vsel %vm434_vm6, %v433_v26, %v407_v25  ;;  %v410_v27 = vpop.xlane.xlu1 %409 }
 0x105   : > { %v411_v28 = vmax.f32 %v410_v27, 0.0 }
 0x107   : > { %v437_v29 = vsel %vm436_vm7, %v435_v5, %v411_v28 }
 0x108   : > { %439 = vst.msk [vmem:[%s153_s29] sm:$0xf] %vm438_vm8, %v437_v29 }
 0x109   : > { %659 = shalt.err (!%p656_p5)
}
 0x10a   : > { %s660_s22 = scalar_lea.hbm %s966_s12, 64  ;;  %s664_s25 = scalar_lea.hbm %s1016_s1, 128 }
 0x10b   : > { %p661_p4 = scmp.ne.s32.totalorder %s966_s12, %s660_s22  ;;  %p665_p12 = scmp.lt.u32.totalorder %s966_s12, %s1016_s1 }
 0x10c   : > { %p666_p1 = scmp.lt.u32.totalorder %s664_s25, %s660_s22  ;;  %p668_p8 = scmp.lt.u32.totalorder %s660_s22, %s966_s12 }
 0x10d   : > { %p662_p7 = pnand %p661_p4, %p1024_p9 }
 0x10e   : > { %p667_p3 = por %p666_p1, %p665_p12 }
 0x10f   : > { %p663_p10 = pneg %p662_p7 }
 0x110   : > { %p669_p11 = por %p668_p8, %p667_p3 }
 0x112   : > { %p670_p0 = pnand %p669_p11, %p663_p10 }
 0x114   : > { %673 = shalt.err (!%p670_p0)
}
 0x115   : > { %554 = dma.vmem_to_hbm [thread:$0]  (%p1024_p9), %s968_s30, 64, %s966_s12, %s441_s9  }
 0x116 PF: > { %s467_s3 = sand.u32 1, %s708_s6   ;;  %p1025_p6 = scmp.ne.s32.totalorder %s1021_s21, 0 }
 0x117   : > { %p1026_p13 = scmp.ge.s32.totalorder %s728_s11, 2  ;;  %s468_s4 = scalar_lea.sflag [#allocation4], %s467_s3 }
 0x119   : > { %p561_p2 = pnand %p1026_p13, %p1025_p6 }
 0x11b   : > { %703 = dma.done.wait (!%p561_p2), %s468_s4, 64  }
 0x11c   : > { %705 = vsyncadd (!%p561_p2), %s468_s4, 4294967232  ;;  %s17_s11 = sadd.s32 1, %s728_s11   ;;  %s1027_s6 = smov %s712_s7 }
 0x11d   : > { %p14_p5 = scmp.ge.s32.totalorder %s17_s11, 4   ;;  %s1028_s7 = smov %s716_s8 }
 0x11e   : > { %s1029_s8 = smov %s800_s20  ;;  %s1030_s9 = smov %s724_s10 }
 0x11f   : > { %s1031_s10 = smov %s1033_s14  ;;  %16 = sbr.rel (!%p14_p5) target bundleno = 6 (0x6), region = 69 }
 0x126   :  { %473 = vsyncpa [#allocation3], 1 }
 0x127   :  { %475 = vsyncpa [#allocation3 + $0x1], 1 }
 0x128   :  { %476 = vsyncpa [#allocation4], 1 }
 0x129   :  { %478 = vsyncpa [#allocation4 + $0x1], 1 }

</bundles_post_ra>
